<compile_context>
chip_gen: v5e
topology: v5e:2x2
jax: 0.10.0
libtpu: 0.0.40
codegen_flags: <defaults>
</compile_context>

<pallas_src>
import jax
import jax.numpy as jnp
import numpy as np
from jax.experimental import pallas as pl
from jax.experimental.pallas import tpu as pltpu

_LANE = 128
_TARGET_BLOCK_BYTES = 2 * 1024 * 1024  # ~2 MiB per block: 2x(in)+2x(out) (+2x residual
                                       # in the fused variant) stays under the 16 MiB
                                       # v5e default scoped VMEM with headroom.


# ---------------------------------------------------------------------------
# Kernels
# ---------------------------------------------------------------------------
def _drop_path_kernel(scale_ref, x_ref, o_ref):
    # scale_ref: SMEM (B,) float32 per-sample multiplier (0 or 1/keep_prob)
    # x_ref/o_ref: VMEM (1, TR, 128) lane-dense tile of the current sample
    s = scale_ref[pl.program_id(0)].astype(x_ref.dtype)   # scalar cast, not vector
    o_ref[...] = x_ref[...] * s


def _drop_path_add_kernel(scale_ref, res_ref, x_ref, o_ref):
    # Fused: out = residual + x * scale  (one HBM pass instead of two)
    s = scale_ref[pl.program_id(0)].astype(x_ref.dtype)
    o_ref[...] = res_ref[...] + x_ref[...] * s


# ---------------------------------------------------------------------------
# Layout helpers
# ---------------------------------------------------------------------------
def _to_lane_slab(x):
    """View x as a lane-dense (B, R, 128) slab. Free (view-only) if F % 128 == 0."""
    B = x.shape[0]
    F = int(np.prod(x.shape[1:])) if x.ndim > 1 else 1
    xf = x.reshape(B, F)
    pad = (-F) % _LANE
    if pad:
        # TODO(synk): handle the ragged tail with an in-kernel masked store
        # (pltpu.store + lane mask on the last block) to avoid this extra
        # HBM pad/slice round trip.  DiT hidden sizes are multiples of 128,
        # so the fast path below is the one that matters.
        xf = jnp.pad(xf, ((0, 0), (0, pad)))
    R = (F + pad) // _LANE
    return xf.reshape(B, R, _LANE), F, pad


def _from_lane_slab(y3, orig_shape, F, pad):
    B = y3.shape[0]
    yf = y3.reshape(B, F + pad)
    if pad:
        yf = yf[:, :F]
    return yf.reshape(orig_shape)


def _tile_rows(R, itemsize):
    """Rows per block: ~_TARGET_BLOCK_BYTES, a multiple of 8 (sublane), capped at R."""
    tr = max(8, (_TARGET_BLOCK_BYTES // (_LANE * itemsize)) // 8 * 8)
    return int(R) if R <= tr else int(tr)


def _launch(kernel, arrays, scale, out_dtype, donate_index=None):
    """arrays: list of (B, R, 128) slabs with identical shape."""
    B, R, _ = arrays[0].shape
    tr = _tile_rows(R, np.dtype(out_dtype).itemsize)
    tile_spec = pl.BlockSpec((1, tr, _LANE), lambda b, r: (b, r, 0))
    io_aliases = {} if donate_index is None else {donate_index: 0}
    return pl.pallas_call(
        kernel,
        out_shape=jax.ShapeDtypeStruct((B, R, _LANE), out_dtype),
        grid=(B, pl.cdiv(R, tr)),
        in_specs=[pl.BlockSpec(memory_space=pltpu.MemorySpace.SMEM)]
                 + [tile_spec] * len(arrays),
        out_specs=tile_spec,
        compiler_params=pltpu.CompilerParams(
            dimension_semantics=("parallel", "parallel"),  # shard (B, R) over v7x TCs
        ),
        input_output_aliases=io_aliases,
    )(scale, *arrays)


# ---------------------------------------------------------------------------
# Pallas-backed data paths
# ---------------------------------------------------------------------------
def _drop_path_pallas(x, scale, *, donate=False):
    """x: [B, ...]; scale: [B] float32 multiplier (already includes 1/keep_prob)."""
    x3, F, pad = _to_lane_slab(x)
    out = _launch(_drop_path_kernel, [x3], scale, x.dtype,
                  donate_index=(1 if donate else None))
    return _from_lane_slab(out, x.shape, F, pad)


def _drop_path_add_pallas(residual, x, scale):
    x3, F, pad = _to_lane_slab(x)
    r3, _, _ = _to_lane_slab(residual)
    out = _launch(_drop_path_add_kernel, [r3, x3], scale, x.dtype)
    return _from_lane_slab(out, x.shape, F, pad)


# ---------------------------------------------------------------------------
# Public forward passes
# ---------------------------------------------------------------------------
def _make_scale(x, drop_prob, scale_by_keep, key):
    if key is None:
        raise ValueError(
            "drop_path: a PRNG `key` is required when training with drop_prob > 0")
    keep_prob = 1.0 - drop_prob
    B = x.shape[0]
    mask = jax.random.bernoulli(key, p=keep_prob, shape=(B,)).astype(jnp.float32)
    if keep_prob > 0.0 and scale_by_keep:
        return mask / keep_prob
    return mask


def drop_path_forward(x, drop_prob=0.0, training=False, scale_by_keep=True,
                      *, key=None, donate=False):
    """DropPath.forward — matches the PyTorch module exactly.

    If donate=True the input buffer is aliased to the output (do NOT reuse x
    after the call); lowers peak HBM footprint for large activations.
    """
    if drop_prob == 0.0 or not training:
        return x                                   # identity path, as in PyTorch
    scale = _make_scale(x, drop_prob, scale_by_keep, key)
    return _drop_path_pallas(x, scale, donate=donate)


def drop_path_add_forward(residual, x, drop_prob=0.0, training=False,
                          scale_by_keep=True, *, key=None):
    """Fused `residual + drop_path(x)` — the usual DiT residual-branch pattern,
    done in a single HBM pass (read residual, read x, write out)."""
    if drop_prob == 0.0 or not training:
        return residual + x
    scale = _make_scale(x, drop_prob, scale_by_keep, key)
    return _drop_path_add_pallas(residual, x, scale)


# ---------------------------------------------------------------------------
# Pure-JAX references (given the same per-sample scale)
# ---------------------------------------------------------------------------
def drop_path_reference(x, scale):
    shape = (x.shape[0],) + (1,) * (x.ndim - 1)
    return x * scale.reshape(shape).astype(x.dtype)


if __name__ == "__main__":
    # NOTE: these are deliberately SMALL correctness shapes.  Do not draw perf
    # conclusions here — benchmark at real DiT sizes (e.g. B x 4096 x 1152).
    B, C, H, W = 2, 4, 16, 16
    drop_prob = 0.25
    keep_prob = 1.0 - drop_prob

    root = jax.random.PRNGKey(0)
    kx, kres, kmask, krag = jax.random.split(root, 4)
    x = jax.random.normal(kx, (B, C, H, W), dtype=jnp.float32)
    residual = jax.random.normal(kres, (B, C, H, W), dtype=jnp.float32)

    # Reference per-sample scale (identical draw to the kernel wrapper).
    mask = jax.random.bernoulli(kmask, p=keep_prob, shape=(B,)).astype(jnp.float32)
    scale = mask / keep_prob
    ref = drop_path_reference(x, scale)

    # --- training path: kernel does the per-sample masking -----------------
    out = drop_path_forward(x, drop_prob=drop_prob, training=True,
                            scale_by_keep=True, key=kmask)
    out = jax.block_until_ready(out)
    np.testing.assert_allclose(np.asarray(out), np.asarray(ref),
                               rtol=1e-6, atol=1e-6)

    # Semantic check: every sample is either zeroed or scaled by 1/keep_prob.
    out_np, x_np = np.asarray(out), np.asarray(x)
    for b in range(B):
        zeroed = np.allclose(out_np[b], 0.0)
        scaled = np.allclose(out_np[b], x_np[b] / keep_prob, rtol=1e-6, atol=1e-6)
        assert zeroed or scaled, f"sample {b} is neither dropped nor correctly scaled"

    # --- fused residual + drop_path(x) -------------------------------------
    out_add = drop_path_add_forward(residual, x, drop_prob=drop_prob,
                                    training=True, scale_by_keep=True, key=kmask)
    out_add = jax.block_until_ready(out_add)
    np.testing.assert_allclose(np.asarray(out_add), np.asarray(residual + ref),
                               rtol=1e-6, atol=1e-6)

    # --- bf16 input (vector math stays in bf16; scalar scale cast in-kernel) -
    x_bf = x.astype(jnp.bfloat16)
    out_bf = drop_path_forward(x_bf, drop_prob=drop_prob, training=True,
                               scale_by_keep=True, key=kmask)
    out_bf = jax.block_until_ready(out_bf)
    ref_bf = drop_path_reference(x_bf, scale)
    np.testing.assert_allclose(np.asarray(out_bf, dtype=np.float32),
                               np.asarray(ref_bf, dtype=np.float32),
                               rtol=1e-2, atol=1e-2)

    # --- ragged feature count (F % 128 != 0) falls back to the pad path -----
    x_rag = jax.random.normal(krag, (B, 5, 10), dtype=jnp.float32)
    out_rag = drop_path_forward(x_rag, drop_prob=drop_prob, training=True,
                                scale_by_keep=True, key=kmask)
    out_rag = jax.block_until_ready(out_rag)
    np.testing.assert_allclose(np.asarray(out_rag),
                               np.asarray(drop_path_reference(x_rag, scale)),
                               rtol=1e-6, atol=1e-6)

    # --- donate=True (in-place style write; x_don not reused afterwards) ----
    x_don = x + 0.0
    out_don = drop_path_forward(x_don, drop_prob=drop_prob, training=True,
                                scale_by_keep=True, key=kmask, donate=True)
    out_don = jax.block_until_ready(out_don)
    np.testing.assert_allclose(np.asarray(out_don), np.asarray(ref),
                               rtol=1e-6, atol=1e-6)

    # --- eval / drop_prob == 0 paths: exact identity, as in the PyTorch module
    out_eval = drop_path_forward(x, drop_prob=drop_prob, training=False)
    np.testing.assert_array_equal(np.asarray(out_eval), np.asarray(x))
    out_p0 = drop_path_forward(x, drop_prob=0.0, training=True, key=kmask)
    np.testing.assert_array_equal(np.asarray(out_p0), np.asarray(x))

    print("KERNEL_OK")
</pallas_src>

<mosaic_0001>
module attributes {stable_mosaic.version = 11 : i64} {
  func.func @_drop_path_kernel(%arg0: i32, %arg1: i32, %arg2: memref<2xf32, #tpu.memory_space<smem>>, %arg3: memref<1x8x128xf32, #tpu.memory_space<vmem>>, %arg4: memref<1x8x128xf32, #tpu.memory_space<vmem>>) attributes {dimension_semantics = [#tpu.dimension_semantics<parallel>, #tpu.dimension_semantics<parallel>], iteration_bounds = array<i64: 2, 1>, scalar_prefetch = 0 : i64, scratch_operands = 0 : i64, tpu.core_type = #tpu.core_type<tc>, window_params = [{transform_indices = @transform_0, window_bounds = array<i64: 2>}, {transform_indices = @transform_1, window_bounds = array<i64: 1, 8, 128>}, {transform_indices = @transform_2, window_bounds = array<i64: 1, 8, 128>}]} {
    %0 = arith.index_cast %arg0 : i32 to index
    %1 = memref.load %arg2[%0] : memref<2xf32, #tpu.memory_space<smem>>
    %c0 = arith.constant 0 : index
    %c0_0 = arith.constant 0 : index
    %c0_1 = arith.constant 0 : index
    %2 = vector.load %arg3[%c0, %c0_0, %c0_1] : memref<1x8x128xf32, #tpu.memory_space<vmem>>, vector<1x8x128xf32>
    %3 = vector.broadcast %1 : f32 to vector<1x8x128xf32>
    %4 = arith.mulf %2, %3 : vector<1x8x128xf32>
    %c0_2 = arith.constant 0 : index
    %c0_3 = arith.constant 0 : index
    %c0_4 = arith.constant 0 : index
    %5 = vector.load %arg4[%c0_2, %c0_3, %c0_4] : memref<1x8x128xf32, #tpu.memory_space<vmem>>, vector<1x8x128xf32>
    tpu.vector_store %arg4[%c0_2, %c0_3, %c0_4], %4 {strides = array<i32>} : memref<1x8x128xf32, #tpu.memory_space<vmem>>, vector<1x8x128xf32>,
    return
  }
  func.func @transform_0(%arg0: i32, %arg1: i32) -> i32 {
    %c0_i32 = arith.constant 0 : i32
    %c0_i32_0 = arith.constant 0 : i32
    return %c0_i32 : i32
  }
  func.func @transform_1(%arg0: i32, %arg1: i32) -> (i32, i32, i32) {
    %c0_i32 = arith.constant 0 : i32
    %c0_i32_0 = arith.constant 0 : i32
    return %arg0, %arg1, %c0_i32 : i32, i32, i32
  }
  func.func @transform_2(%arg0: i32, %arg1: i32) -> (i32, i32, i32) {
    %c0_i32 = arith.constant 0 : i32
    %c0_i32_0 = arith.constant 0 : i32
    return %arg0, %arg1, %c0_i32 : i32, i32, i32
  }
}

</mosaic_0001>

<bundles_post_ra>
// kernel: tpu_custom_call.1
= control target key start
LH: loop header
LB: loop body
LE: loop exit
PB: predicated region body
PF: predicated region fallthrough
CT: control target
= control target key end

     0   :  { %7 = vsyncpa [#allocation5], 0  ;;  %s689_s0 = inlined_call_operand.hbm [shape: f32[2], index: 0, kind: input, shape index: {}]   ;;  %s690_s1 = inlined_call_operand.hbm [shape: f32[2,8,128], index: 1, kind: input, shape index: {}]   ;;  %s691_s2 = inlined_call_operand.hbm [shape: f32[2,8,128], index: 2, kind: output, shape index: {}]  }
   0x1   :  { %8 = vsyncpa [#allocation3], 0 }
   0x2   :  { %10 = vsyncpa [#allocation3 + $0x1], 0 }
   0x3   :  { %11 = vsyncpa [#allocation4], 0 }
   0x4   :  { %13 = vsyncpa [#allocation4 + $0x1], 0  ;;  %s543_s9 = smov 0   ;;  %s545_s10 = smov 0  }
   0x5   :  { %s547_s11 = smov 0   ;;  %s549_s12 = smov 0  }
   0x6   :  { %s551_s13 = smov 0   ;;  %s553_s14 = smov 0  }
   0x7 LB: > { %s306_s15 = sadd.s32 4294967295, %s525_s14   ;;  %s307_s16 = sadd.s32 4294967294, %s525_s14   ;;  %s525_s14 = sphi %s553_s14, %s19_s14   ;;  %s521_s13 = sphi %s551_s13, %s703_s13   ;;  %s517_s12 = sphi %s549_s12, %s702_s12   ;;  %s513_s11 = sphi %s547_s11, %s701_s11   ;;  %s509_s10 = sphi %s545_s10, %s700_s10   ;;  %s505_s9 = sphi %s543_s9, %s699_s9  }
   0x8   : > { %p74_p0 = scmp.ne.s32.totalorder %s509_s10, %s505_s9  ;;  %p577_p1 = scmp.eq.s32.totalorder %s306_s15, 0 }
   0x9   : > { %p581_p2 = scmp.eq.s32.totalorder %s306_s15, 1  ;;  %p106_p3 = scmp.eq.s32.totalorder %s307_s16, 1 }
   0xa   : > { %p587_p4 = por %p577_p1, %p74_p0  ;;  %p308_p5 = scmp.ge.s32.totalorder %s525_s14, 1 }
   0xb   : > { %p592_p6 = por %p106_p3, %p74_p0  ;;  %p113_p7 = scmp.lt.s32.totalorder %s525_s14, 3 }
   0xc   : > { %s125_s23 = sshll.u32 %s689_s0, 4  ;;  %s31_s25 = sadd.s32 1, %s521_s13  ;;  %s126_s23 = int_to_ptr.hbm [resolvable:$true] %s125_s23 }
   0xd   : > { %p600_p8 = pnand %p308_p5, %p113_p7  ;;  %s61_s26 = sadd.s32 1, %s513_s11 }
   0xe   : > { %p33_p12 = scmp.ge.s32.totalorder %s31_s25, 2  ;;  %s527_s27 = smov [#allocation2]  }
   0xf   : > { %p329_p10 = pneg %p600_p8  ;;  %p68_p13 = scmp.ne.s32.totalorder %s513_s11, %s509_s10 }
  0x10   : > { %s705_s25 = smov (%p33_p12, %s31_s25), 0  ;;  %p69_p0 = scmp.eq.s32.totalorder %s525_s14, 0 }
  0x11   : > { %p330_p11 = pnand %p329_p10, %p577_p1  ;;  %s56_s28 = ssub.s32 %s521_s13, %s705_s25 }
  0x12   : > { %p342_p3 = scmp.lt.s32.totalorder %s525_s14, 2  ;;  %p59_p5 = scmp.eq.s32.totalorder %s56_s28, 0 }
  0x13   : > { %332 = dma.hbm_to_smem (!%p330_p11), %s126_s23, 16, %s527_s27, [#allocation5]  }
  0x14   : > { %p70_p7 = por %p69_p0, %p68_p13  ;;  %p621_p9 = por %p581_p2, %p68_p13 }
  0x15   : > { %s136_s30 = sand.u32 1, %s513_s11   ;;  %s312_s5 = sshll.u32 %s521_s13, 3 }
  0x16   : > { %s627_s3 = scalar_select %p59_p5, %s513_s11, %s61_s26  }
  0x17   : > { %s311_s4 = sshll.u32 %s136_s30, 3  ;;  %s145_s8 = scalar_lea.hbm %s690_s1, %s312_s5 }
  0x18   : > { %s140_s15 = scalar_lea.vmem [#allocation6], %s311_s4  ;;  %s147_s21 = sshll.u32 %s145_s8, 4  ;;  %s148_s21 = int_to_ptr.hbm [resolvable:$true] %s147_s21 }
  0x19   : > { %s149_s16 = sshll.u32 %s140_s15, 4  ;;  %p334_p10 = pnand %p342_p3, %p70_p7  ;;  %s150_s16 = int_to_ptr.vmem [resolvable:$true] %s149_s16 }
  0x1a   : > { %s137_s18 = scalar_lea.sflag [#allocation3], %s136_s30  ;;  %158 = sbr.rel (%p600_p8) target bundleno = 53 (0x35), region = 28 }
  0x1b   : > { %336 = dma.hbm_to_vmem [thread:$0]  (!%p334_p10), %s148_s21, 128, %s150_s16, %s137_s18  }
  0x1f   : > { %492 = dma.done.wait (%p577_p1), [#allocation5], 16  }
  0x20   : > { %494 = vsyncadd (%p577_p1), [#allocation5], 4294967280  ;;  %s642_s22 = sand.u32 1, %s509_s10  }
  0x21   : > { %s315_s23 = sshll.u32 %s642_s22, 3  ;;  %s166_s26 = scalar_lea.sflag [#allocation3], %s642_s22 }
  0x22   : > { %s169_s27 = scalar_lea.vmem [#allocation6], %s315_s23 }
  0x23   : > { %496 = dma.done.wait (%p587_p4), %s166_s26, 128  }
  0x24   : > { %498 = vsyncadd (%p587_p4), %s166_s26, 4294967168 }
  0x25   : > { %175 = sfence }
  0x26   : > { %s192_s17 = sld [smem:[#allocation2 + %s517_s12]]  ;;  %s318_s24 = sshll.u32 %s517_s12, 3  ;;  %v193_v0 = vld [vmem:[%s169_s27] sm:$0xff] }
  0x27   : > { %s209_s4 = scalar_lea.hbm %s691_s2, %s318_s24  ;;  %s191_s5 = scalar_lea.vmem [#allocation7], %s315_s23 }
  0x28   : > { %s211_s6 = sshll.u32 %s191_s5, 4  ;;  %s213_s7 = sshll.u32 %s209_s4, 4  ;;  %s212_s6 = int_to_ptr.vmem [resolvable:$true] %s211_s6  ;;  %s214_s7 = int_to_ptr.hbm [resolvable:$true] %s213_s7 }
  0x29   : > { %s198_s19 = scalar_lea.sflag [#allocation4], %s642_s22  ;;  %s453_s8 = sshra.s32 %s214_s7, 4  ;;  %s454_s8 = int_to_ptr.hbm [resolvable:$true] %s453_s8 }
  0x2a   : > { %s455_s15 = scalar_lea.hbm %s454_s8, 8  ;;  %s459_s21 = scalar_lea.hbm %s691_s2, 16 }
  0x2b   : > { %p456_p1 = scmp.ne.s32.totalorder %s454_s8, %s455_s15  ;;  %p460_p8 = scmp.lt.s32.totalorder %s454_s8, %s691_s2 }
  0x2c   : > { %v194_v1 = vstv %s192_s17  ;;  %p461_p11 = scmp.lt.s32.totalorder %s459_s21, %s455_s15 }
  0x2d   : > { %v195_v2 = vmul.f32 %v194_v1, %v193_v0  ;;  %p457_p2 = pnand %p456_p1, %p621_p9 }
  0x2e   : > { %p462_p12 = por %p461_p11, %p460_p8 }
  0x2f   : > { %196 = vst [vmem:[%s191_s5] sm:$0xff] %v195_v2  ;;  %p458_p4 = pneg %p457_p2 }
  0x31   : > { %p463_p13 = pnand %p462_p12, %p458_p4 }
  0x33   : > { %466 = shalt.err (!%p463_p13)
}
  0x34   : > { %327 = dma.vmem_to_hbm [thread:$0]  (%p621_p9), %s212_s6, 128, %s214_s7, %s198_s19  }
  0x35 PF: > { %s225_s22 = sand.u32 1, %s505_s9   ;;  %p698_p0 = scmp.ge.s32.totalorder %s525_s14, 2 }
  0x36   : > { %s226_s26 = scalar_lea.sflag [#allocation4], %s225_s22 }
  0x37   : > { %p338_p3 = pnand %p698_p0, %p592_p6 }
  0x39   : > { %p339_p5 = pneg %p338_p3 }
  0x3b   : > { %500 = dma.done.wait (%p339_p5), %s226_s26, 128  }
  0x3c   : > { %502 = vsyncadd (%p339_p5), %s226_s26, 4294967168  ;;  %s19_s14 = sadd.s32 1, %s525_s14   ;;  %s699_s9 = smov %s509_s10 }
  0x3d   : > { %p16_p7 = scmp.ge.s32.totalorder %s19_s14, 4   ;;  %s700_s10 = smov %s513_s11 }
  0x3e   : > { %s701_s11 = smov %s627_s3  ;;  %s702_s12 = smov %s521_s13 }
  0x3f   : > { %s703_s13 = smov %s705_s25  ;;  %18 = sbr.rel (!%p16_p7) target bundleno = 7 (0x7), region = 78 }
  0x44   :  { %232 = vsyncpa [#allocation3], 1 }
  0x45   :  { %234 = vsyncpa [#allocation3 + $0x1], 1 }
  0x46   :  { %235 = vsyncpa [#allocation4], 1 }
  0x47   :  { %237 = vsyncpa [#allocation4 + $0x1], 1 }
  0x48   :  { %238 = vsyncpa [#allocation5], 1 }
  0x49   :  { %240 = vsyncpa [#allocation5 + $0x1], 1 }

</bundles_post_ra>
